<compile_context>
chip_gen: v5e
topology: v5e:2x2
jax: 0.10.0
libtpu: 0.0.40
codegen_flags: <defaults>
</compile_context>

<pallas_src>
import math
import jax
import jax.numpy as jnp
from jax.experimental import pallas as pl
from jax.experimental.pallas import tpu as pltpu


def _round_up(x: int, m: int) -> int:
    return ((x + m - 1) // m) * m


def _sine_kernel(tau_ref, w_ref, b_ref, m_ref, o_ref):
    # tau_ref: (TB, pack)  packed tau rows (pack batch rows per output row)
    # w_ref:   (pack, L)   group-masked, lane-tiled fused weights
    # b_ref:   (1, L)      lane-tiled fused bias
    # m_ref:   (1, L)      1.0 on the linear (w0) lane of each group, else 0.0
    # o_ref:   (TB, L)     packed output, L = pack * out_features
    #
    # Rank-`pack` contraction on the MXU; VALU stays free for sin's polynomial.
    y = jnp.dot(tau_ref[...], w_ref[...],
                preferred_element_type=jnp.float32,
                precision=jax.lax.Precision.HIGHEST) + b_ref[...]
    # sin() on every lane except the linear (w0) lane of each group.
    o_ref[...] = jnp.where(m_ref[...] > 0.5, y, jnp.sin(y)).astype(o_ref.dtype)


def sine_activation(tau, w_full, b_full, *, block_rows: int = 2048,
                    out_dtype=jnp.float32):
    """tau: (B, 1); w_full: (1, out_f); b_full: (1, out_f) -> (B, out_f)."""
    B, in_f = tau.shape
    in_f2, out_f = w_full.shape
    assert in_f == 1 and in_f2 == 1, (
        "SineActivation is only well-defined for in_features == 1")

    # --- lane packing: L = lcm(out_f, 128), pack batch rows per output row --
    L = math.lcm(out_f, 128)
    pack = L // out_f                      # = 128 // gcd(out_f, 128), divides 128

    tau_flat = tau.reshape(B).astype(jnp.float32)
    R = pl.cdiv(B, pack)                   # packed output rows needed

    # --- tile sizing --------------------------------------------------------
    # VMEM per grid step (x2 double-buffering):
    #   input  (TB, pack) lane-pads to (TB, 128) f32  -> TB*128*4  per buffer
    #   output (TB, L) out_dtype                      -> TB*L*isz  per buffer
    out_isz = jnp.dtype(out_dtype).itemsize
    bytes_per_row = 2 * (128 * 4 + L * out_isz)
    tb_cap = max(8, ((8 << 20) // bytes_per_row) // 8 * 8)   # keep ~<= 8 MiB
    block_rows = min(block_rows, tb_cap)

    if R <= 16:
        # Tiny batch: a single sublane-aligned tile.
        TB = _round_up(max(R, 8), 8)
        n_tiles = 1
    else:
        # >= 4 grid steps for pipelining; even count so v7x's 2 TCs split it.
        TB = min(block_rows, max(8, _round_up(pl.cdiv(R, 4), 8)))
        n_tiles = pl.cdiv(R, TB)
        if n_tiles % 2:
            n_tiles += 1
    R_pad = n_tiles * TB
    B_pad = R_pad * pack
    if B_pad != B:
        tau_flat = jnp.pad(tau_flat, (0, B_pad - B))
    tau_packed = tau_flat.reshape(R_pad, pack)

    # --- fused, lane-tiled params -------------------------------------------
    w_flat = w_full.reshape(out_f).astype(jnp.float32)
    b_flat = b_full.reshape(out_f).astype(jnp.float32)
    lane = jnp.arange(L)
    grp = lane // out_f
    # Row g carries the fused weights only for its own out_f-lane group, so the
    # (TB, pack) @ (pack, L) MXU dot reproduces the per-group broadcast FMA.
    w_grouped = jnp.where(grp[None, :] == jnp.arange(pack)[:, None],
                          jnp.tile(w_flat, pack)[None, :],
                          0.0).astype(jnp.float32)                 # (pack, L)
    b_tiled = jnp.tile(b_flat, pack)[None, :].astype(jnp.float32)  # (1, L)
    lin_mask = ((lane % out_f) == (out_f - 1)
                ).astype(jnp.float32)[None, :]                     # (1, L)

    out_packed = pl.pallas_call(
        _sine_kernel,
        out_shape=jax.ShapeDtypeStruct((R_pad, L), out_dtype),
        grid=(n_tiles,),
        in_specs=[
            pl.BlockSpec((TB, pack), lambda i: (i, 0)),
            pl.BlockSpec((pack, L), lambda i: (0, 0)),
            pl.BlockSpec((1, L), lambda i: (0, 0)),
            pl.BlockSpec((1, L), lambda i: (0, 0)),
        ],
        out_specs=pl.BlockSpec((TB, L), lambda i: (i, 0)),
        compiler_params=pltpu.CompilerParams(
            dimension_semantics=("parallel",)),
        cost_estimate=pl.CostEstimate(
            flops=2 * B_pad * out_f,
            transcendentals=B_pad * (out_f - 1),
            bytes_accessed=4 * B_pad                      # tau
                           + out_isz * B_pad * out_f      # output
                           + 4 * (pack * L + 2 * L),      # weights/bias/mask
        ),
    )(tau_packed, w_grouped, b_tiled, lin_mask)

    # Free reinterpretation of the contiguous packed buffer back to (B, out_f).
    return out_packed.reshape(B_pad, out_f)[:B]


def init_sine_activation_params(key, in_features: int, out_features: int):
    """Deterministic init mimicking torch.nn.Linear (uniform +/- 1/sqrt(fan_in))."""
    k_w, k_b, k_w0, k_b0 = jax.random.split(key, 4)
    bound = 1.0 / math.sqrt(in_features)
    # self.w : Linear(in_features, out_features - 1)
    w = jax.random.uniform(
        k_w, (in_features, out_features - 1), jnp.float32, -bound, bound)
    b = jax.random.uniform(k_b, (out_features - 1,), jnp.float32, -bound, bound)
    # self.w0 : Linear(1, 1)   (in_features must be 1 for the module)
    w0 = jax.random.uniform(k_w0, (in_features, 1), jnp.float32, -1.0, 1.0)
    b0 = jax.random.uniform(k_b0, (1,), jnp.float32, -1.0, 1.0)
    # Fuse: last output column is the w0 branch.
    w_full = jnp.concatenate([w, w0], axis=-1)              # (in_f, out_f)
    b_full = jnp.concatenate([b, b0], axis=-1)[None, :]     # (1, out_f)
    return w_full, b_full


def _reference(tau, w_full, b_full):
    y = tau @ w_full + b_full
    return jnp.concatenate([jnp.sin(y[:, :-1]), y[:, -1:]], axis=-1)


if __name__ == "__main__":
    in_features = 1      # required by the module (w0 = Linear(1, 1) on same tau)
    key = jax.random.PRNGKey(0)
    k_tau, k_params, k_tau2, k_params3, k_tau3 = jax.random.split(key, 5)

    # Case 1: out_f = 32 (pack=4, L=128), tiny batch -> single-tile path.
    out_features, B = 32, 8
    w_full, b_full = init_sine_activation_params(k_params, in_features, out_features)
    tau = jax.random.normal(k_tau, (B, in_features), dtype=jnp.float32)
    out = jax.block_until_ready(sine_activation(tau, w_full, b_full))
    ref = _reference(tau, w_full, b_full)
    assert out.shape == (B, out_features)
    assert jnp.allclose(out, ref, atol=1e-5, rtol=1e-5)

    # Case 2: larger batch -> multi-tile (even grid) + batch-padding path.
    B2 = 200
    tau2 = jax.random.normal(k_tau2, (B2, in_features), dtype=jnp.float32)
    out2 = jax.block_until_ready(sine_activation(tau2, w_full, b_full))
    assert jnp.allclose(out2, _reference(tau2, w_full, b_full),
                        atol=1e-5, rtol=1e-5)

    # Case 3: out_f = 48 -> lcm packing (pack=8, L=384); no masked-store fallback.
    out_f3, B3 = 48, 16
    w3, b3 = init_sine_activation_params(k_params3, in_features, out_f3)
    tau3 = jax.random.normal(k_tau3, (B3, in_features), dtype=jnp.float32)
    out3 = jax.block_until_ready(sine_activation(tau3, w3, b3))
    assert jnp.allclose(out3, _reference(tau3, w3, b3), atol=1e-5, rtol=1e-5)

    # Case 4: bf16 output path (halves store bytes; useful on store-bound v5e).
    out4 = jax.block_until_ready(
        sine_activation(tau2, w_full, b_full, out_dtype=jnp.bfloat16))
    assert jnp.allclose(out4.astype(jnp.float32),
                        _reference(tau2, w_full, b_full),
                        atol=2e-2, rtol=2e-2)

    print("KERNEL_OK")
</pallas_src>

<mosaic_0001>
module attributes {stable_mosaic.version = 11 : i64} {
  func.func @_sine_kernel(%arg0: i32, %arg1: memref<8x4xf32, #tpu.memory_space<vmem>>, %arg2: memref<4x128xf32, #tpu.memory_space<vmem>>, %arg3: memref<1x128xf32, #tpu.memory_space<vmem>>, %arg4: memref<1x128xf32, #tpu.memory_space<vmem>>, %arg5: memref<8x128xf32, #tpu.memory_space<vmem>>) attributes {dimension_semantics = [#tpu.dimension_semantics<parallel>], iteration_bounds = array<i64: 1>, scalar_prefetch = 0 : i64, scratch_operands = 0 : i64, tpu.core_type = #tpu.core_type<tc>, window_params = [{transform_indices = @transform_0, window_bounds = array<i64: 8, 4>}, {pipeline_mode = #tpu.pipeline_mode<synchronous>, transform_indices = @transform_1, window_bounds = array<i64: 4, 128>}, {pipeline_mode = #tpu.pipeline_mode<synchronous>, transform_indices = @transform_2, window_bounds = array<i64: 1, 128>}, {pipeline_mode = #tpu.pipeline_mode<synchronous>, transform_indices = @transform_3, window_bounds = array<i64: 1, 128>}, {transform_indices = @transform_4, window_bounds = array<i64: 8, 128>}]} {
    %c0 = arith.constant 0 : index
    %c0_0 = arith.constant 0 : index
    %0 = vector.load %arg1[%c0, %c0_0] : memref<8x4xf32, #tpu.memory_space<vmem>>, vector<8x4xf32>
    %c0_1 = arith.constant 0 : index
    %c0_2 = arith.constant 0 : index
    %1 = vector.load %arg2[%c0_1, %c0_2] : memref<4x128xf32, #tpu.memory_space<vmem>>, vector<4x128xf32>
    %cst = arith.constant dense<0.000000e+00> : vector<8x128xf32>
    %2 = tpu.matmul %0, %1, %cst {dimension_numbers = #tpu.dot_dimension_numbers<[1], [0], [0], [1], [0, 0, 1, 1], [], []>, precision = #tpu.contract_precision<fp32>} : vector<8x4xf32>, vector<4x128xf32>, vector<8x128xf32> -> vector<8x128xf32>
    %c0_3 = arith.constant 0 : index
    %c0_4 = arith.constant 0 : index
    %3 = vector.load %arg3[%c0_3, %c0_4] : memref<1x128xf32, #tpu.memory_space<vmem>>, vector<1x128xf32>
    %4 = vector.broadcast %3 : vector<1x128xf32> to vector<8x128xf32>
    %5 = arith.addf %2, %4 : vector<8x128xf32>
    %c0_5 = arith.constant 0 : index
    %c0_6 = arith.constant 0 : index
    %6 = vector.load %arg4[%c0_5, %c0_6] : memref<1x128xf32, #tpu.memory_space<vmem>>, vector<1x128xf32>
    %cst_7 = arith.constant 5.000000e-01 : f32
    %7 = vector.broadcast %cst_7 : f32 to vector<1x128xf32>
    %8 = arith.cmpf ogt, %6, %7 : vector<1x128xf32>
    %9 = math.sin %5 : vector<8x128xf32>
    %10 = vector.shape_cast %8 : vector<1x128xi1> to vector<1x128xi1>
    %11 = vector.broadcast %10 : vector<1x128xi1> to vector<8x128xi1>
    %12 = arith.select %11, %5, %9 : vector<8x128xi1>, vector<8x128xf32>
    %c0_8 = arith.constant 0 : index
    %c0_9 = arith.constant 0 : index
    %13 = vector.load %arg5[%c0_8, %c0_9] : memref<8x128xf32, #tpu.memory_space<vmem>>, vector<8x128xf32>
    tpu.vector_store %arg5[%c0_8, %c0_9], %12 {strides = array<i32>} : memref<8x128xf32, #tpu.memory_space<vmem>>, vector<8x128xf32>,
    return
  }
  func.func @transform_0(%arg0: i32) -> (i32, i32) {
    %c0_i32 = arith.constant 0 : i32
    %c0_i32_0 = arith.constant 0 : i32
    return %arg0, %c0_i32 : i32, i32
  }
  func.func @transform_1(%arg0: i32) -> (i32, i32) {
    %c0_i32 = arith.constant 0 : i32
    %c0_i32_0 = arith.constant 0 : i32
    %c0_i32_1 = arith.constant 0 : i32
    return %c0_i32, %c0_i32_0 : i32, i32
  }
  func.func @transform_2(%arg0: i32) -> (i32, i32) {
    %c0_i32 = arith.constant 0 : i32
    %c0_i32_0 = arith.constant 0 : i32
    %c0_i32_1 = arith.constant 0 : i32
    return %c0_i32, %c0_i32_0 : i32, i32
  }
  func.func @transform_3(%arg0: i32) -> (i32, i32) {
    %c0_i32 = arith.constant 0 : i32
    %c0_i32_0 = arith.constant 0 : i32
    %c0_i32_1 = arith.constant 0 : i32
    return %c0_i32, %c0_i32_0 : i32, i32
  }
  func.func @transform_4(%arg0: i32) -> (i32, i32) {
    %c0_i32 = arith.constant 0 : i32
    %c0_i32_0 = arith.constant 0 : i32
    return %arg0, %c0_i32 : i32, i32
  }
}

</mosaic_0001>

<bundles_post_ra>
// kernel: tpu_custom_call.1
= control target key start
LH: loop header
LB: loop body
LE: loop exit
PB: predicated region body
PF: predicated region fallthrough
CT: control target
= control target key end

     0   :  { %vm28_vm0 = vcmask 1043456   ;;  %vm24_vm1 = vcmask 31744   ;;  %s512_s0 = inlined_call_operand.vmem [shape: f32[8,4], index: 0, kind: input, shape index: {}]   ;;  %s513_s1 = inlined_call_operand.vmem [shape: f32[4,128], index: 1, kind: input, shape index: {}]   ;;  %s514_s2 = inlined_call_operand.vmem [shape: f32[1,128], index: 2, kind: input, shape index: {}]   ;;  %s515_s3 = inlined_call_operand.vmem [shape: f32[1,128], index: 3, kind: input, shape index: {}]   ;;  %s516_s4 = inlined_call_operand.hbm [shape: f32[8,128], index: 4, kind: output, shape index: {}]  }
   0x1   :  { %v19_v0 = vld [vmem:[%s513_s1] sm:$0xf] }
   0x2   :  { %v18_v1 = vld [vmem:[%s512_s0] sm:$0xff]  ;;  %v30_v2 = vsel %vm28_vm0, %v19_v0, 0 }
   0x3   :  { %v26_v3 = vsel %vm24_vm1, %v18_v1, 0  ;;  %v47_v4 = vand.u32 4294901760, %v30_v2 }
   0x4   :  { %v49_v5 = vand.u32 4294901760, %v26_v3 }
   0x5   :  { %9 = vsyncpa [#allocation3], 0  ;;  %v74_v6 = vsub.f32 %v30_v2, %v47_v4  ;;  %48 = vmatpush.msra.mxu0 %v47_v4  ;;  %124 = vmatpush.msra.mxu3 %v47_v4  ;;  %v367_v14 = vld [vmem:[%s514_s2] ss:$0 sm:$0xff]  ;;  %v394_v38 = vmov 683565275  }
   0x6   :  { %v50_v7 = vsub.f32 %v26_v3, %v49_v5  ;;  %v395_v40 = vmov 2475754826   ;;  %v396_v43 = vmov 2131351028   ;;  %v397_v46 = vmov 2102212464  }
   0x7   :  { %101 = vmatpush.msra.mxu2 %v74_v6  ;;  %v75_v9 = vand.u32 4294901760, %v74_v6  ;;  %v398_v49 = vmov 920167782   ;;  %v399_v52 = vmov 1326507024   ;;  %s347_s23 = sshll.u32 %s516_s4, 4  ;;  %s348_s23 = int_to_ptr.hbm [resolvable:$true] %s347_s23 }
   0x8   :  { %v51_v8 = vand.u32 4294901760, %v50_v7  ;;  %104 = vmatmul.f32.vlgmr.msra.gmra.mxu2 %v50_v7 }
   0x9   :  { %150 = vmatpush.msrb.mxu0 %v75_v9  ;;  %v76_v11 = vsub.f32 %v74_v6, %v75_v9 }
   0xa   :  { %v52_v10 = vsub.f32 %v50_v7, %v51_v8  ;;  %128 = vmatmul.f32.vlgmr.msra.gmra.mxu3 %v51_v8 }
   0xb   :  { %v77_v13 = vand.u32 4294901760, %v76_v11 }
   0xc   :  { %v53_v12 = vand.u32 4294901760, %v52_v10 }
   0xd   :  { %78 = vmatpush.msra.mxu1 %v77_v13 }
   0xe   :  { %54 = vmatmul.f32.vlgmr.msra.gmra.mxu0 %v53_v12  ;;  %80 = vmatmul.f32.vlgmr.msra.gmra.mxu1 %v49_v5 }
   0xf   :  { %172 = vmatpush.msrb.mxu1 %v47_v4 }
  0x16   :  { %152 = vmatmul.f32.vlgmr.msrb.gmra.mxu0 %v49_v5  ;;  %174 = vmatmul.f32.vlgmr.msrb.gmra.mxu1 %v49_v5 }
  0x8b   :  { %v55_v15 = vpop.f32.mrf.mxu0  ;;  %v81_v17 = vpop.f32.mrf.mxu1 }
  0x8c   :  { %v56_v16 = vadd.f32 %v367_v14, %v55_v15  ;;  %v105_v18 = vpop.f32.mrf.mxu2 }
  0x8d   :  { %v129_v20 = vpop.f32.mrf.mxu3 }
  0x8e   :  { %v82_v19 = vadd.f32 %v81_v17, %v56_v16 }
  0x90   :  { %v106_v21 = vadd.f32 %v105_v18, %v82_v19 }
  0x92   :  { %v130_v22 = vadd.f32 %v129_v20, %v106_v21 }
  0x93   :  { %v153_v23 = vpop.f32.mrf.mxu0  ;;  %v175_v25 = vpop.f32.mrf.mxu1 }
  0x94   :  { %v154_v24 = vadd.f32 %v153_v23, %v130_v22  ;;  %v400_v22 = vmov 0  }
  0x96   :  { %v436_v26 = vadd.f32 %v175_v25, %v154_v24 }
  0x98   :  { %v183_v27 = vand.u32 2139095040, %v436_v26  ;;  %v180_v30 = vand.u32 2147483647, %v436_v26  ;;  %vm182_vm14 = vcmp.lt.s32.totalorder %v436_v26, 0 }
  0x9a   :  { %v184_v28 = vshrl.u32 %v183_v27, 23  ;;  %v187_v33 = vand.u32 8388607, %v180_v30  ;;  %vm494_vm15 = vcmp.le.f32.partialorder %v180_v30, 0.7853982 }
  0x9c   :  { %v356_v29 = vadd.s32 4294967169, %v184_v28  ;;  %v188_v37 = vor.u32 8388608, %v187_v33 }
  0x9e   :  { %v190_v31 = vadd.s32 1, %v356_v29  ;;  %v453_v59 = vshll.u32 %v188_v37, 8 }
  0xa0   :  { %vm191_vm2 = vcmp.gt.s32.totalorder %v190_v31, 0  ;;  %v229_v4 = vand.u32 65535, %v453_v59  ;;  %v230_v5 = vshrl.u32 %v453_v59, 16 }
  0xa1   :  { %v192_v32 = vsel %vm191_vm2, %v190_v31, 0 }
  0xa2   :  { %v194_v34 = vand.u32 31, %v192_v32  ;;  %v444_v36 = vshrl.u32 %v192_v32, 5 }
  0xa4   :  { %v442_v35 = vsub.s32 32, %v194_v34  ;;  %v197_v39 = vshll.u32 %v394_v38, %v194_v34  ;;  %v200_v41 = vshll.u32 %v395_v40, %v194_v34  ;;  %v203_v45 = vshll.u32 %v396_v43, %v194_v34 }
  0xa5   :  { %v206_v48 = vshll.u32 %v397_v46, %v194_v34  ;;  %v209_v51 = vshll.u32 %v398_v49, %v194_v34  ;;  %vm212_vm3 = vcmp.lt.s32.totalorder %v444_v36, 1  ;;  %vm215_vm4 = vcmp.lt.s32.totalorder %v444_v36, 4 }
  0xa6   :  { %v198_v42 = vshrl.u32 %v395_v40, %v442_v35  ;;  %v201_v44 = vshrl.u32 %v396_v43, %v442_v35  ;;  %v204_v47 = vshrl.u32 %v397_v46, %v442_v35  ;;  %v207_v50 = vshrl.u32 %v398_v49, %v442_v35 }
  0xa7   :  { %v210_v53 = vshrl.u32 %v399_v52, %v442_v35  ;;  %vm214_vm5 = vcmp.lt.s32.totalorder %v444_v36, 3  ;;  %vm213_vm6 = vcmp.lt.s32.totalorder %v444_v36, 2  ;;  %v196_v33 = vshrl.u32 %v394_v38, %v442_v35 }
  0xa8   :  { %v199_v54 = vor.u32 %v198_v42, %v197_v39  ;;  %v202_v55 = vor.u32 %v201_v44, %v200_v41  ;;  %v205_v56 = vor.u32 %v204_v47, %v203_v45  ;;  %v208_v57 = vor.u32 %v207_v50, %v206_v48 }
  0xa9   :  { %v211_v58 = vor.u32 %v210_v53, %v209_v51 }
  0xaa   :  { %v220_v60 = vsel %vm212_vm3, %v199_v54, %v202_v55  ;;  %v224_v61 = vsel %vm212_vm3, %v202_v55, %v205_v56  ;;  %v221_v62 = vsel %vm215_vm4, %v208_v57, 920167782  ;;  %v217_v29 = vsel %vm215_vm4, %v205_v56, 2102212464 }
  0xab   :  { %v225_v63 = vsel %vm215_vm4, %v211_v58, 1326507024  ;;  %v222_v0 = vsel %vm214_vm5, %v205_v56, %v221_v62  ;;  %v216_v42 = vsel %vm212_vm3, %v196_v33, %v199_v54  ;;  %v218_v43 = vsel %vm214_vm5, %v202_v55, %v217_v29 }
  0xac   :  { %v226_v1 = vsel %vm214_vm5, %v208_v57, %v225_v63  ;;  %v223_v2 = vsel %vm213_vm6, %v220_v60, %v222_v0  ;;  %v219_v35 = vsel %vm213_vm6, %v216_v42, %v218_v43  ;;  %vm323_vm5 = vweird.f32 %v436_v26 }
  0xad   :  { %v227_v3 = vsel %vm213_vm6, %v224_v61, %v226_v1  ;;  %v253_v8 = vand.u32 65535, %v223_v2  ;;  %v254_v9 = vshrl.u32 %v223_v2, 16  ;;  %v273_v51 = vmul.u32 %v453_v59, %v219_v35 }
  0xae   :  { %v231_v6 = vand.u32 65535, %v227_v3  ;;  %v232_v7 = vshrl.u32 %v227_v3, 16 }
  0xaf   :  { %v256_v12 = vmul.u32 %v254_v9, %v229_v4  ;;  %v257_v13 = vmul.u32 %v253_v8, %v230_v5  ;;  %v255_v17 = vmul.u32 %v253_v8, %v229_v4  ;;  %v258_v21 = vmul.u32 %v254_v9, %v230_v5 }
  0xb0   :  { %v234_v10 = vmul.u32 %v232_v7, %v229_v4  ;;  %v235_v11 = vmul.u32 %v231_v6, %v230_v5  ;;  %v233_v14 = vmul.u32 %v231_v6, %v229_v4  ;;  %v236_v16 = vmul.u32 %v232_v7, %v230_v5 }
  0xb1   :  { %v259_v18 = vshll.u32 %v256_v12, 16  ;;  %v261_v24 = vshll.u32 %v257_v13, 16  ;;  %v260_v40 = vshrl.u32 %v256_v12, 16  ;;  %v262_v46 = vshrl.u32 %v257_v13, 16 }
  0xb2   :  { %v237_v15 = vshll.u32 %v234_v10, 16  ;;  %v239_v19 = vshll.u32 %v235_v11, 16  ;;  %v238_v34 = vshrl.u32 %v234_v10, 16  ;;  %v240_v44 = vshrl.u32 %v235_v11, 16 }
  0xb3   :  { %vm263_vm8 = vc.u32 %v255_v17, %v259_v18  ;;  %v265_v25 = vadd.s32 %v259_v18, %v255_v17 }
  0xb4   :  { %vm241_vm7 = vc.u32 %v233_v14, %v237_v15  ;;  %v243_v20 = vadd.s32 %v237_v15, %v233_v14  ;;  %v264_v28 = vsel %vm263_vm8, 1, %v400_v22 }
  0xb5   :  { %v242_v23 = vsel %vm241_vm7, 1, %v400_v22  ;;  %v266_v32 = vadd.s32 %v264_v28, %v258_v21  ;;  %vm267_vm10 = vc.u32 %v265_v25, %v261_v24  ;;  %v269_v49 = vadd.s32 %v265_v25, %v261_v24  ;;  %v178_v21 = vld [vmem:[%s515_s3] sm:$0x1]  ;;  %s401_s3 = smov [#allocation2]  }
  0xb6   :  { %v244_v27 = vadd.s32 %v242_v23, %v236_v16  ;;  %vm245_vm9 = vc.u32 %v243_v20, %v239_v19  ;;  %v268_v39 = vsel %vm267_vm10, 1, %v400_v22  ;;  %vm179_vm0 = vcmp.gt.f32.partialorder %v178_v21, 0.5  ;;  %s345_s20 = sshll.u32 %s401_s3, 4  ;;  %s346_s20 = int_to_ptr.vmem [resolvable:$true] %s345_s20 }
  0xb7   :  { %v246_v31 = vsel %vm245_vm9, 1, %v400_v22  ;;  %v270_v41 = vadd.s32 %v268_v39, %v266_v32  ;;  %v335_v32 = vsel %vm179_vm0, 1, %v400_v22 }
  0xb8   :  { %v248_v37 = vadd.s32 %v246_v31, %v244_v27 }
  0xb9   :  { %v271_v47 = vadd.s32 %v270_v41, %v260_v40  ;;  %v336_v41 = vperm.slane %v335_v32, 0 }
  0xba   :  { %v249_v45 = vadd.s32 %v248_v37, %v238_v34 }
  0xbb   :  { %v272_v38 = vadd.s32 %v271_v47, %v262_v46  ;;  %vm337_vm4 = vcmp.eq.s32.totalorder %v336_v41, 1 }
  0xbc   :  { %v250_v48 = vadd.s32 %v249_v45, %v240_v44 }
  0xbd   :  { %v276_v50 = vadd.s32 1, %v272_v38 }
  0xbe   :  { %vm275_vm11 = vc.u32 %v250_v48, %v269_v49  ;;  %v274_v36 = vadd.s32 %v269_v49, %v250_v48 }
  0xbf   :  { %v277_v52 = vsel %vm275_vm11, %v276_v50, %v272_v38 }
  0xc0   :  { %v278_v53 = vadd.s32 %v277_v52, %v273_v51 }
  0xc2   :  { %v279_v54 = vadd.s32 536870912, %v278_v53 }
  0xc4   :  { %v280_v56 = vshrl.u32 %v279_v54, 30 }
  0xc6   :  { %v281_v57 = vshll.u32 %v280_v56, 30  ;;  %v304_v13 = vsub.s32 4, %v280_v56 }
  0xc8   :  { %v282_v55 = vsub.s32 %v278_v53, %v281_v57  ;;  %v305_v18 = vsel %vm182_vm14, %v304_v13, %v280_v56 }
  0xc9   :  { %v307_v30 = vsel %vm494_vm15, 0, %v305_v18 }
  0xca   :  { %vm283_vm12 = vcmp.lt.s32.totalorder %v282_v55, 0  ;;  %v284_v58 = vsub.s32 0, %v282_v55  ;;  %v324_v28 = vadd.s32 3, %v307_v30 }
  0xcc   :  { %v285_v60 = vsel %vm283_vm12, %v284_v58, %v282_v55  ;;  %v325_v37 = vand.u32 3, %v324_v28 }
  0xcd   :  { %v286_v61 = vclz %v285_v60 }
  0xce   :  { %vm327_vm1 = vcmp.eq.s32.totalorder %v325_v37, 0  ;;  %vm330_vm2 = vcmp.eq.s32.totalorder %v325_v37, 2  ;;  %vm326_vm3 = vcmp.lt.s32.totalorder %v325_v37, 2 }
  0xcf   :  { %v357_v62 = vadd.s32 4294967294, %v286_v61 }
  0xd1   :  { %vm358_vm13 = vcmp.lt.s32.totalorder %v357_v62, 0 }
  0xd2   :  { %v289_v63 = vsel %vm358_vm13, 0, %v357_v62 }
  0xd3   :  { %v290_v0 = vsub.s32 32, %v289_v63  ;;  %v294_v1 = vsub.s32 4294967266, %v289_v63  ;;  %v291_v2 = vshll.u32 %v282_v55, %v289_v63 }
  0xd5   :  { %v292_v3 = vshrl.u32 %v274_v36, %v290_v0  ;;  %v295_v4 = vadd.s32 127, %v294_v1 }
  0xd7   :  { %v293_v59 = vor.u32 %v292_v3, %v291_v2  ;;  %v296_v5 = vshll.u32 %v295_v4, 23 }
  0xd9   :  { %v297_v6 = vor.u32 4788187, %v296_v5  ;;  %v300_v8 = vcvt.s32.f32 %v293_v59 }
  0xdb   :  { %v298_v7 = vand.u32 2147483647, %v297_v6 }
  0xdd   :  { %v301_v9 = vmul.f32 %v300_v8, %v298_v7 }
  0xdf   :  { %v302_v10 = vxor.u32 2147483648, %v301_v9 }
  0xe1   :  { %v303_v12 = vsel %vm182_vm14, %v302_v10, %v301_v9 }
  0xe2   :  { %v306_v14 = vsel %vm494_vm15, %v436_v26, %v303_v12 }
  0xe3   :  { %v308_v15 = vmul.f32 %v306_v14, %v306_v14 }
  0xe5   :  { %v309_v16 = vmul.f32 -0.001358992, %v308_v15  ;;  %v316_v17 = vmul.f32 -0.00019511016, %v308_v15 }
  0xe7   :  { %v310_v19 = vadd.f32 0.041655596, %v309_v16  ;;  %v317_v20 = vadd.f32 0.008332121, %v316_v17 }
  0xe9   :  { %v311_v23 = vmul.f32 %v310_v19, %v308_v15  ;;  %v318_v24 = vmul.f32 %v317_v20, %v308_v15 }
  0xeb   :  { %v312_v25 = vadd.f32 -0.4999988, %v311_v23  ;;  %v319_v27 = vadd.f32 -0.16666654, %v318_v24 }
  0xed   :  { %v313_v29 = vmul.f32 %v312_v25, %v308_v15  ;;  %v320_v31 = vmul.f32 %v319_v27, %v308_v15 }
  0xef   :  { %v314_v33 = vadd.f32 1.0, %v313_v29  ;;  %v321_v34 = vadd.f32 1.0, %v320_v31 }
  0xf1   :  { %v322_v39 = vmul.f32 %v321_v34, %v306_v14  ;;  %v331_v40 = vxor.u32 2147483648, %v314_v33 }
  0xf3   :  { %v328_v42 = vxor.u32 2147483648, %v322_v39  ;;  %v332_v44 = vsel %vm330_vm2, %v331_v40, %v322_v39 }
  0xf5   :  { %v329_v43 = vsel %vm327_vm1, %v314_v33, %v328_v42 }
  0xf6   :  { %v333_v22 = vsel %vm326_vm3, %v329_v43, %v332_v44 }
  0xf7   :  { %v334_v45 = vsel %vm323_vm5, nan, %v333_v22 }
  0xf8   :  { %v338_v46 = vsel %vm337_vm4, %v436_v26, %v334_v45 }
  0xf9   :  { %339 = vst [vmem:[#allocation2] sm:$0xff] %v338_v46 }
  0xfa   :  { %350 = dma.vmem_to_hbm [thread:$0]  %s346_s20, 128, %s348_s23, [#allocation3]  }
  0xfb   :  { %392 = dma.done.wait [#allocation3], 128  }
  0xfc   :  { %393 = vsyncadd [#allocation3], 4294967168 }
  0xfd   :  { %355 = vsyncpa [#allocation3], 1 }

</bundles_post_ra>
